<compile_context>
chip_gen: v5e
topology: v5e:2x2
jax: 0.10.0
libtpu: 0.0.40
codegen_flags: <defaults>
</compile_context>

<pallas_src>
import jax
import jax.numpy as jnp
from jax.experimental import pallas as pl
from jax.experimental.pallas import tpu as pltpu


def _mlp_kernel(x_ref, w1_ref, b1_ref, w2_ref, b2_ref, w3_ref, b3_ref, o_ref):
    # x_ref: (TN, in_dim) f32   w1: (in_dim, H) bf16   w2: (H, H) bf16
    # w3:    (1, H) f32 row     biases f32             o_ref: (1, TN) f32

    # ---- Layer 1: Linear + ReLU (MXU, bf16 operands, f32 accumulate) ----
    x = x_ref[...].astype(jnp.bfloat16)
    h1 = jnp.dot(x, w1_ref[...], preferred_element_type=jnp.float32)
    h1 = jnp.maximum(h1 + b1_ref[...], 0.0)            # b1: (1, H) broadcasts
    # Dropout(p=0.2) == identity in eval mode.

    # ---- Layer 2: Linear + ReLU (MXU) ----
    h2 = jnp.dot(h1.astype(jnp.bfloat16), w2_ref[...],
                 preferred_element_type=jnp.float32)
    h2 = jnp.maximum(h2 + b2_ref[...], 0.0)             # (TN, H) f32
    # Dropout(p=0.2) == identity in eval mode.

    # ---- Layer 3: Linear(H, 1) + Sigmoid, off the MXU ----
    # Multiply by the w3 row first (single sublane-broadcast VPU mul), cast to
    # bf16 so the XLU transpose moves half the vregs, then sublane-reduce with
    # f32 accumulation so the per-row scalars land lane-dense in (1, TN).
    h2w = (h2 * w3_ref[...]).astype(jnp.bfloat16)       # (TN, H) bf16
    o = jnp.sum(h2w.T.astype(jnp.float32), axis=0, keepdims=True)  # (1, TN)
    o = jax.nn.sigmoid(o + b3_ref[...])                 # b3: (1, 1) broadcasts
    o_ref[...] = o.astype(o_ref.dtype)


def _auto_tile_n(N, in_dim):
    """Largest tile with >= 4 grid steps and a modest double-buffered x tile.

    4096 is safe on all generations (v5e/v6e/v7x VMEM budgets); smaller tiles
    are chosen for small N so the grid still has enough steps to pipeline and
    to shard across v7x's two TensorCores.
    """
    in_dim_lanes = ((max(in_dim, 1) + 127) // 128) * 128   # lane padding
    for t in (4096, 2048, 1024, 512, 256, 128):
        x_tile_bytes = 2 * t * in_dim_lanes * 4            # 2 pipeline buffers
        if N >= 4 * t and x_tile_bytes <= (16 << 20):
            return t
    return 128


def feature_decoder_mlp(features, params, *, tile_n=None):
    """features: (N, in_dim) float32 -> (N, 1) float32 occupancy."""
    w1, b1, w2, b2, w3, b3 = params
    N, in_dim = features.shape
    H = w1.shape[1]
    if tile_n is None:
        tile_n = _auto_tile_n(N, in_dim)
    assert tile_n % 128 == 0, "tile_n must be a multiple of 128"
    assert H % 128 == 0, "hidden_dim must be a multiple of 128"

    # Pad N up to a multiple of tile_n (padded rows are computed and dropped).
    n_blocks = pl.cdiv(N, tile_n)
    n_pad = n_blocks * tile_n
    if n_pad != N:
        features = jnp.pad(features, ((0, n_pad - N), (0, 0)))

    # Weights for the MXU layers are shipped as bf16 (native MXU path);
    # biases / w3 stay f32.  w3 is passed as a (1, H) ROW so the in-kernel
    # broadcast is a single sublane splat instead of 128 lane splats.
    w1b = w1.astype(jnp.bfloat16)
    w2b = w2.astype(jnp.bfloat16)
    w3_row = w3.reshape(1, H)

    out = pl.pallas_call(
        _mlp_kernel,
        out_shape=jax.ShapeDtypeStruct((1, n_pad), jnp.float32),
        grid_spec=pltpu.PrefetchScalarGridSpec(
            num_scalar_prefetch=0,
            grid=(n_blocks,),
            in_specs=[
                pl.BlockSpec((tile_n, in_dim), lambda i: (i, 0)),   # x tile
                pl.BlockSpec((in_dim, H),      lambda i: (0, 0)),   # w1 (bf16)
                pl.BlockSpec((1, H),           lambda i: (0, 0)),   # b1
                pl.BlockSpec((H, H),           lambda i: (0, 0)),   # w2 (bf16)
                pl.BlockSpec((1, H),           lambda i: (0, 0)),   # b2
                pl.BlockSpec((1, H),           lambda i: (0, 0)),   # w3 row
                pl.BlockSpec((1, 1),           lambda i: (0, 0)),   # b3
            ],
            # Lane-dense output: each grid step writes one (1, tile_n) lane row.
            out_specs=pl.BlockSpec((1, tile_n), lambda i: (0, i)),
        ),
        compiler_params=pltpu.CompilerParams(
            dimension_semantics=("parallel",),
            # Explicit scoped-VMEM limit so large tiles never get silently
            # capped (well under physical VMEM on v5e/v6e and v7x's 64 MiB/TC).
            vmem_limit_bytes=48 * 1024 * 1024,
        ),
    )(features, w1b, b1, w2b, b2, w3_row, b3)

    # Single slice+reshape; when N == n_pad this is a pure relayout (no extra
    # padded-copy pass).
    return out[0, :N].reshape(N, 1)


def init_params(key, in_dim, hidden_dim):
    """Deterministic init mimicking nn.Linear (uniform(-1/sqrt(fan_in), ...))."""
    ks = jax.random.split(key, 6)

    def lin(kw, kb, fan_in, fan_out):
        bound = 1.0 / jnp.sqrt(jnp.float32(fan_in))
        w = jax.random.uniform(kw, (fan_in, fan_out), jnp.float32, -bound, bound)
        b = jax.random.uniform(kb, (1, fan_out), jnp.float32, -bound, bound)
        return w, b

    w1, b1 = lin(ks[0], ks[1], in_dim, hidden_dim)
    w2, b2 = lin(ks[2], ks[3], hidden_dim, hidden_dim)
    w3, b3 = lin(ks[4], ks[5], hidden_dim, 1)
    return (w1, b1, w2, b2, w3, b3)


def reference_mlp(features, params):
    """Reference that applies the same bf16 rounding as the kernel."""
    w1, b1, w2, b2, w3, b3 = params
    x = features.astype(jnp.bfloat16)
    h = jnp.dot(x, w1.astype(jnp.bfloat16), preferred_element_type=jnp.float32)
    h = jnp.maximum(h + b1, 0.0)
    h = jnp.dot(h.astype(jnp.bfloat16), w2.astype(jnp.bfloat16),
                preferred_element_type=jnp.float32)
    h = jnp.maximum(h + b2, 0.0)
    # Layer 3 matches the kernel's bf16-before-reduce rounding.
    h3 = (h * w3.reshape(1, -1)).astype(jnp.bfloat16).astype(jnp.float32)
    logit = jnp.sum(h3, axis=1, keepdims=True) + b3
    return jax.nn.sigmoid(logit)


if __name__ == "__main__":
    key = jax.random.PRNGKey(0)
    k_x, k_p = jax.random.split(key)

    # Small test shapes; N deliberately NOT a multiple of the auto-chosen tile
    # to exercise the padding path with several grid steps.
    N, in_dim, hidden_dim = 2000, 32, 128
    features = jax.random.normal(k_x, (N, in_dim), jnp.float32)
    params = init_params(k_p, in_dim, hidden_dim)

    out = feature_decoder_mlp(features, params)       # auto tile_n (=256 here)
    out = jax.block_until_ready(out)

    ref = reference_mlp(features, params)
    assert out.shape == (N, 1)
    max_err = float(jnp.max(jnp.abs(out - ref)))
    assert jnp.allclose(out, ref, atol=2e-3, rtol=0.0), f"max err {max_err}"

    print("KERNEL_OK")
</pallas_src>

<mosaic_0001>
module attributes {stable_mosaic.version = 11 : i64} {
  func.func @_mlp_kernel(%arg0: i32, %arg1: memref<256x32xf32, #tpu.memory_space<vmem>>, %arg2: memref<32x128xbf16, #tpu.memory_space<vmem>>, %arg3: memref<1x128xf32, #tpu.memory_space<vmem>>, %arg4: memref<128x128xbf16, #tpu.memory_space<vmem>>, %arg5: memref<1x128xf32, #tpu.memory_space<vmem>>, %arg6: memref<1x128xf32, #tpu.memory_space<vmem>>, %arg7: memref<1x1xf32, #tpu.memory_space<vmem>>, %arg8: memref<1x256xf32, #tpu.memory_space<vmem>>) attributes {dimension_semantics = [#tpu.dimension_semantics<parallel>], iteration_bounds = array<i64: 8>, scalar_prefetch = 0 : i64, scratch_operands = 0 : i64, tpu.core_type = #tpu.core_type<tc>, window_params = [{transform_indices = @transform_0, window_bounds = array<i64: 256, 32>}, {pipeline_mode = #tpu.pipeline_mode<synchronous>, transform_indices = @transform_1, window_bounds = array<i64: 32, 128>}, {pipeline_mode = #tpu.pipeline_mode<synchronous>, transform_indices = @transform_2, window_bounds = array<i64: 1, 128>}, {pipeline_mode = #tpu.pipeline_mode<synchronous>, transform_indices = @transform_3, window_bounds = array<i64: 128, 128>}, {pipeline_mode = #tpu.pipeline_mode<synchronous>, transform_indices = @transform_4, window_bounds = array<i64: 1, 128>}, {pipeline_mode = #tpu.pipeline_mode<synchronous>, transform_indices = @transform_5, window_bounds = array<i64: 1, 128>}, {pipeline_mode = #tpu.pipeline_mode<synchronous>, transform_indices = @transform_6, window_bounds = array<i64: 1, 1>}, {transform_indices = @transform_7, window_bounds = array<i64: 1, 256>}]} {
    %c0 = arith.constant 0 : index
    %c0_0 = arith.constant 0 : index
    %0 = vector.load %arg1[%c0, %c0_0] : memref<256x32xf32, #tpu.memory_space<vmem>>, vector<256x32xf32>
    %1 = arith.truncf %0 : vector<256x32xf32> to vector<256x32xbf16>
    %c0_1 = arith.constant 0 : index
    %c0_2 = arith.constant 0 : index
    %2 = vector.load %arg2[%c0_1, %c0_2] : memref<32x128xbf16, #tpu.memory_space<vmem>>, vector<32x128xbf16>
    %cst = arith.constant dense<0.000000e+00> : vector<256x128xf32>
    %3 = tpu.matmul %1, %2, %cst {dimension_numbers = #tpu.dot_dimension_numbers<[1], [0], [0], [1], [0, 0, 1, 1], [], []>} : vector<256x32xbf16>, vector<32x128xbf16>, vector<256x128xf32> -> vector<256x128xf32>
    %c0_3 = arith.constant 0 : index
    %c0_4 = arith.constant 0 : index
    %4 = vector.load %arg3[%c0_3, %c0_4] : memref<1x128xf32, #tpu.memory_space<vmem>>, vector<1x128xf32>
    %5 = vector.broadcast %4 : vector<1x128xf32> to vector<256x128xf32>
    %6 = arith.addf %3, %5 : vector<256x128xf32>
    %cst_5 = arith.constant 0.000000e+00 : f32
    %7 = vector.broadcast %cst_5 : f32 to vector<256x128xf32>
    %8 = arith.maximumf %6, %7 : vector<256x128xf32>
    %9 = arith.truncf %8 : vector<256x128xf32> to vector<256x128xbf16>
    %c0_6 = arith.constant 0 : index
    %c0_7 = arith.constant 0 : index
    %10 = vector.load %arg4[%c0_6, %c0_7] : memref<128x128xbf16, #tpu.memory_space<vmem>>, vector<128x128xbf16>
    %cst_8 = arith.constant dense<0.000000e+00> : vector<256x128xf32>
    %11 = tpu.matmul %9, %10, %cst_8 {dimension_numbers = #tpu.dot_dimension_numbers<[1], [0], [0], [1], [0, 0, 1, 1], [], []>} : vector<256x128xbf16>, vector<128x128xbf16>, vector<256x128xf32> -> vector<256x128xf32>
    %c0_9 = arith.constant 0 : index
    %c0_10 = arith.constant 0 : index
    %12 = vector.load %arg5[%c0_9, %c0_10] : memref<1x128xf32, #tpu.memory_space<vmem>>, vector<1x128xf32>
    %13 = vector.broadcast %12 : vector<1x128xf32> to vector<256x128xf32>
    %14 = arith.addf %11, %13 : vector<256x128xf32>
    %cst_11 = arith.constant 0.000000e+00 : f32
    %15 = vector.broadcast %cst_11 : f32 to vector<256x128xf32>
    %16 = arith.maximumf %14, %15 : vector<256x128xf32>
    %c0_12 = arith.constant 0 : index
    %c0_13 = arith.constant 0 : index
    %17 = vector.load %arg6[%c0_12, %c0_13] : memref<1x128xf32, #tpu.memory_space<vmem>>, vector<1x128xf32>
    %18 = vector.broadcast %17 : vector<1x128xf32> to vector<256x128xf32>
    %19 = arith.mulf %16, %18 : vector<256x128xf32>
    %20 = arith.truncf %19 : vector<256x128xf32> to vector<256x128xbf16>
    %21 = tpu.transpose %20, [1, 0] : vector<256x128xbf16> -> vector<128x256xbf16>
    %22 = arith.extf %21 : vector<128x256xbf16> to vector<128x256xf32>
    %cst_14 = arith.constant dense<0.000000e+00> : vector<256xf32>
    %23 = vector.multi_reduction <add>, %22, %cst_14 [0] : vector<128x256xf32> to vector<256xf32>
    %24 = vector.shape_cast %23 : vector<256xf32> to vector<1x256xf32>
    %c0_15 = arith.constant 0 : index
    %c0_16 = arith.constant 0 : index
    %25 = vector.load %arg7[%c0_15, %c0_16] : memref<1x1xf32, #tpu.memory_space<vmem>>, vector<1x1xf32>
    %26 = vector.broadcast %25 : vector<1x1xf32> to vector<1x256xf32>
    %27 = arith.addf %24, %26 : vector<1x256xf32>
    %28 = arith.negf %27 : vector<1x256xf32>
    %29 = math.exp %28 : vector<1x256xf32>
    %cst_17 = arith.constant 1.000000e+00 : f32
    %30 = vector.broadcast %cst_17 : f32 to vector<1x256xf32>
    %31 = arith.addf %30, %29 : vector<1x256xf32>
    %32 = arith.divf %30, %31 : vector<1x256xf32>
    %c0_18 = arith.constant 0 : index
    %c0_19 = arith.constant 0 : index
    %33 = vector.load %arg8[%c0_18, %c0_19] : memref<1x256xf32, #tpu.memory_space<vmem>>, vector<1x256xf32>
    tpu.vector_store %arg8[%c0_18, %c0_19], %32 {strides = array<i32>} : memref<1x256xf32, #tpu.memory_space<vmem>>, vector<1x256xf32>,
    return
  }
  func.func @transform_0(%arg0: i32) -> (i32, i32) {
    %c0_i32 = arith.constant 0 : i32
    %c0_i32_0 = arith.constant 0 : i32
    return %arg0, %c0_i32 : i32, i32
  }
  func.func @transform_1(%arg0: i32) -> (i32, i32) {
    %c0_i32 = arith.constant 0 : i32
    %c0_i32_0 = arith.constant 0 : i32
    %c0_i32_1 = arith.constant 0 : i32
    return %c0_i32, %c0_i32_0 : i32, i32
  }
  func.func @transform_2(%arg0: i32) -> (i32, i32) {
    %c0_i32 = arith.constant 0 : i32
    %c0_i32_0 = arith.constant 0 : i32
    %c0_i32_1 = arith.constant 0 : i32
    return %c0_i32, %c0_i32_0 : i32, i32
  }
  func.func @transform_3(%arg0: i32) -> (i32, i32) {
    %c0_i32 = arith.constant 0 : i32
    %c0_i32_0 = arith.constant 0 : i32
    %c0_i32_1 = arith.constant 0 : i32
    return %c0_i32, %c0_i32_0 : i32, i32
  }
  func.func @transform_4(%arg0: i32) -> (i32, i32) {
    %c0_i32 = arith.constant 0 : i32
    %c0_i32_0 = arith.constant 0 : i32
    %c0_i32_1 = arith.constant 0 : i32
    return %c0_i32, %c0_i32_0 : i32, i32
  }
  func.func @transform_5(%arg0: i32) -> (i32, i32) {
    %c0_i32 = arith.constant 0 : i32
    %c0_i32_0 = arith.constant 0 : i32
    %c0_i32_1 = arith.constant 0 : i32
    return %c0_i32, %c0_i32_0 : i32, i32
  }
  func.func @transform_6(%arg0: i32) -> (i32, i32) {
    %c0_i32 = arith.constant 0 : i32
    %c0_i32_0 = arith.constant 0 : i32
    %c0_i32_1 = arith.constant 0 : i32
    return %c0_i32, %c0_i32_0 : i32, i32
  }
  func.func @transform_7(%arg0: i32) -> (i32, i32) {
    %c0_i32 = arith.constant 0 : i32
    %c0_i32_0 = arith.constant 0 : i32
    return %c0_i32, %arg0 : i32, i32
  }
}

</mosaic_0001>

<bundles_post_ra>
// kernel: tpu_custom_call.1
= control target key start
LH: loop header
LB: loop body
LE: loop exit
PB: predicated region body
PF: predicated region fallthrough
CT: control target
= control target key end

     0   :  { %s1579_s0 = inlined_call_operand.vmem [shape: f32[2048,32], index: 0, kind: input, shape index: {}]   ;;  %s1580_s1 = inlined_call_operand.vmem [shape: bf16[32,128], index: 1, kind: input, shape index: {}]   ;;  %s1581_s2 = inlined_call_operand.vmem [shape: f32[1,128], index: 2, kind: input, shape index: {}]   ;;  %s1582_s3 = inlined_call_operand.vmem [shape: bf16[128,128], index: 3, kind: input, shape index: {}]   ;;  %s1583_s4 = inlined_call_operand.vmem [shape: f32[1,128], index: 4, kind: input, shape index: {}]   ;;  %s1584_s5 = inlined_call_operand.vmem [shape: f32[1,128], index: 5, kind: input, shape index: {}]   ;;  %s1585_s6 = inlined_call_operand.<no memory space> [shape: f32[1,1], index: 6, kind: input, shape index: {}]   ;;  %s1586_s7 = inlined_call_operand.hbm [shape: f32[1,2048], index: 7, kind: output, shape index: {}]  }
   0x1   :  { %v12_v0 = vstv %s1585_s6 }
   0x2   :  { %13 = vst [vmem:[#allocation2] sm:$0x1] %v12_v0 }
   0x3   :  { %14 = vsyncpa [#allocation4], 0 }
   0x4   :  { %16 = vsyncpa [#allocation4 + $0x1], 0  ;;  %s1291_s26 = smov 0   ;;  %s1293_s27 = smov 0  }
   0x5   :  { %s1295_s28 = smov 0   ;;  %s1297_s29 = smov 0  }
   0x6 LB: > { %s1312_s6 = sadd.s32 4294967295, %s1245_s29   ;;  %s1017_s30 = sadd.s32 4294967294, %s1245_s29   ;;  %s1245_s29 = sphi %s1297_s29, %s1594_s29   ;;  %s1241_s28 = sphi %s1295_s28, %s1593_s28   ;;  %s1237_s27 = sphi %s1293_s27, %s1592_s27   ;;  %s1233_s26 = sphi %s1291_s26, %s1591_s26  }
   0x7   : > { %s1316_s8 = sadd.s32 1, %s1245_s29   ;;  %s181_s9 = sadd.s32 1, %s1241_s28 }
   0x8   : > { %s178_s10 = ssub.s32 %s1245_s29, %s1316_s8  ;;  %p191_p0 = scmp.ne.s32.totalorder %s1241_s28, %s1237_s27 }
   0x9   : > { %p179_p1 = scmp.eq.s32.totalorder %s178_s10, 0  ;;  %p192_p2 = scmp.eq.s32.totalorder %s1312_s6, 7 }
   0xa   : > { %p197_p3 = scmp.ne.s32.totalorder %s1237_s27, %s1233_s26  ;;  %p198_p4 = scmp.eq.s32.totalorder %s1017_s30, 7 }
   0xb   : > { %s1327_s11 = scalar_select %p179_p1, %s1241_s28, %s181_s9  }
   0xc   : > { %p1329_p5 = por %p192_p2, %p191_p0  ;;  %p1333_p6 = por %p198_p4, %p197_p3 }
   0xd   : > { %p1020_p7 = scmp.ge.s32.totalorder %s1245_s29, 1  ;;  %p243_p8 = scmp.lt.s32.totalorder %s1245_s29, 9 }
   0xf   : > { %p244_p9 = pnand %p1020_p7, %p243_p8 }
  0x10   : > { %s1022_s16 = sshll.u32 (!%p244_p9), %s1312_s6, 5  ;;  %s272_s15 = sand.u32 (!%p244_p9), 1, %s1237_s27  }
  0x11   : > { %247 = sbr.rel (%p244_p9) target bundleno = 793 (0x319), region = 48  ;;  %p276_p10 = scmp.lt.s32.totalorder (!%p244_p9), %s1022_s16, 255 }
  0x12   : > { %s1083_s17 = sshll.u32 (!%p244_p9), %s1312_s6, 1  ;;  %s943_s24 = scalar_lea.sflag (!%p244_p9), [#allocation4], %s272_s15 }
  0x13   : > { %s953_s20 = scalar_lea.hbm (!%p244_p9), %s1586_s7, %s1083_s17  ;;  %s1203_s10 = scalar_lea.hbm (!%p244_p9), %s1586_s7, 16 }
  0x14   : > { %s957_s23 = sshll.u32 (!%p244_p9), %s953_s20, 4  ;;  %s958_s23 = int_to_ptr.hbm [resolvable:$true] %s957_s23 }
  0x15   : > { %s1197_s25 = sshra.s32 (!%p244_p9), %s958_s23, 4  ;;  %s1198_s25 = int_to_ptr.hbm [resolvable:$true] %s1197_s25 }
  0x16   : > { %v1087_v1 = vld [vmem:[%s1580_s1 + $0x8] sm:$0xff]  ;;  %v1086_v2 = vld [vmem:[%s1580_s1] sm:$0xff]  ;;  %s1596_s16 = smov (!%p276_p10, %s1022_s16), 255  ;;  %vm351_vm0 = vcmask 261120   ;;  %v1095_v18 = vld [vmem:[%s1582_s3 + $0x38] sm:$0xff]  ;;  %vm934_vm8 = vcmask 1040384   ;;  %p1204_p0 = scmp.lt.s32.totalorder %s1198_s25, %s1586_s7 }
  0x17   : > { %406 = vmatpush.bf16.msra.mxu0 %v1087_v1  ;;  %1096 = vmatpush.bf16.msra.mxu3 %v1087_v1  ;;  %s1023_s19 = sshll.u32 %s1596_s16, 3  ;;  %v1094_v22 = vld [vmem:[%s1582_s3 + $0x30] sm:$0xff]  ;;  %v1093_v23 = vld [vmem:[%s1582_s3 + $0x28] sm:$0xff]  ;;  %v1092_v24 = vld [vmem:[%s1582_s3 + $0x20] sm:$0xff]  ;;  %s1537_s16 = sshll.u32 %s272_s15, 1 }
  0x18   : > { %s1349_s22 = scalar_lea.vmem %s1579_s0, %s1023_s19  ;;  %605 = vmatpush.bf16.msra.mxu1 %v1095_v18  ;;  %1098 = vmatpush.bf16.msra.mxu2 %v1095_v18  ;;  %v1091_v27 = vld [vmem:[%s1582_s3 + $0x18] sm:$0xff]  ;;  %v1090_v29 = vld [vmem:[%s1582_s3 + $0x10] sm:$0xff]  ;;  %v1089_v33 = vld [vmem:[%s1582_s3 + $0x8] sm:$0xff]  ;;  %s274_s6 = scalar_lea.vmem [#allocation3], %s1537_s16 }
  0x19   : > { %v283_v3 = vld [vmem:[%s1349_s22] sm:$0xff]  ;;  %v284_v4 = vld [vmem:[%s1349_s22 + $0x8] sm:$0xff]  ;;  %v285_v6 = vld [vmem:[%s1349_s22 + $0x10] sm:$0xff]  ;;  %s955_s21 = sshll.u32 %s274_s6, 4  ;;  %s1199_s30 = scalar_lea.hbm %s1198_s25, 2  ;;  %s956_s21 = int_to_ptr.vmem [resolvable:$true] %s955_s21 }
  0x1a   : > { %v315_v5 = vpack.c.bf16 %v284_v4, %v283_v3  ;;  %v286_v7 = vld [vmem:[%s1349_s22 + $0x18] sm:$0xff]  ;;  %v287_v9 = vld [vmem:[%s1349_s22 + $0x20] sm:$0xff]  ;;  %v288_v10 = vld [vmem:[%s1349_s22 + $0x28] sm:$0xff]  ;;  %p1200_p11 = scmp.ne.s32.totalorder %s1198_s25, %s1199_s30  ;;  %p1205_p1 = scmp.lt.s32.totalorder %s1203_s10, %s1199_s30 }
  0x1b   : > { %407 = vmatpush.bf16.msra.mxu0 %v1086_v2  ;;  %1097 = vmatpush.bf16.msra.mxu3 %v1086_v2  ;;  %v316_v8 = vpack.c.bf16 %v286_v7, %v285_v6  ;;  %v317_v11 = vpack.c.bf16 %v288_v10, %v287_v9  ;;  %v289_v12 = vld [vmem:[%s1349_s22 + $0x30] sm:$0xff]  ;;  %v290_v13 = vld [vmem:[%s1349_s22 + $0x38] sm:$0xff]  ;;  %v291_v15 = vld [vmem:[%s1349_s22 + $0x40] sm:$0xff] }
  0x1c   : > { %v318_v14 = vpack.c.bf16 %v290_v13, %v289_v12  ;;  %v292_v16 = vld [vmem:[%s1349_s22 + $0x48] sm:$0xff]  ;;  %v293_v19 = vld [vmem:[%s1349_s22 + $0x50] sm:$0xff]  ;;  %v294_v20 = vld [vmem:[%s1349_s22 + $0x58] sm:$0xff]  ;;  %606 = vmatpush.bf16.msra.mxu1 %v1094_v22  ;;  %1099 = vmatpush.bf16.msra.mxu2 %v1094_v22  ;;  %p1201_p12 = pnand %p1200_p11, %p1329_p5  ;;  %p1206_p2 = por %p1205_p1, %p1204_p0 }
  0x1d   : > { %v319_v17 = vpack.c.bf16 %v292_v16, %v291_v15  ;;  %v320_v21 = vpack.c.bf16 %v294_v20, %v293_v19  ;;  %v295_v25 = vld [vmem:[%s1349_s22 + $0x60] sm:$0xff]  ;;  %v296_v26 = vld [vmem:[%s1349_s22 + $0x68] sm:$0xff]  ;;  %v301_v30 = vld [vmem:[%s1349_s22 + $0x90] sm:$0xff] }
  0x1e   : > { %1032 = vmatmul.msk.bf16.vlgmr.msra.gmra.mxu0 %vm351_vm0, %v315_v5  ;;  %v321_v28 = vpack.c.bf16 %v296_v26, %v295_v25  ;;  %v302_v31 = vld [vmem:[%s1349_s22 + $0x98] sm:$0xff]  ;;  %v1088_v34 = vld [vmem:[%s1582_s3] sm:$0xff]  ;;  %v297_v35 = vld [vmem:[%s1349_s22 + $0x70] sm:$0xff]  ;;  %p1202_p13 = pneg %p1201_p12 }
  0x1f   : > { %v324_v32 = vpack.c.bf16 %v302_v31, %v301_v30  ;;  %v298_v36 = vld [vmem:[%s1349_s22 + $0x78] sm:$0xff]  ;;  %v303_v38 = vld [vmem:[%s1349_s22 + $0xa0] sm:$0xff]  ;;  %v304_v39 = vld [vmem:[%s1349_s22 + $0xa8] sm:$0xff] }
  0x20   : > { %607 = vmatpush.bf16.msra.mxu1 %v1093_v23  ;;  %1100 = vmatpush.bf16.msra.mxu2 %v1093_v23  ;;  %v322_v37 = vpack.c.bf16 %v298_v36, %v297_v35  ;;  %v325_v40 = vpack.c.bf16 %v304_v39, %v303_v38  ;;  %v299_v41 = vld [vmem:[%s1349_s22 + $0x80] sm:$0xff]  ;;  %v300_v42 = vld [vmem:[%s1349_s22 + $0x88] sm:$0xff]  ;;  %v305_v45 = vld [vmem:[%s1349_s22 + $0xb0] sm:$0xff]  ;;  %p1207_p3 = pnand %p1206_p2, %p1202_p13 }
  0x21   : > { %1041 = vmatmul.msk.bf16.vlgmr.msra.gmra.mxu3 %vm351_vm0, %v324_v32  ;;  %v323_v43 = vpack.c.bf16 %v300_v42, %v299_v41  ;;  %v306_v46 = vld [vmem:[%s1349_s22 + $0xb8] sm:$0xff]  ;;  %v1412_v47 = vld [vmem:[%s1581_s2] ss:$0 sm:$0xff]  ;;  %v308_v57 = vld [vmem:[%s1349_s22 + $0xc8] sm:$0xff] }
  0x22   : > { %v326_v48 = vpack.c.bf16 %v306_v46, %v305_v45  ;;  %v307_v56 = vld [vmem:[%s1349_s22 + $0xc0] sm:$0xff]  ;;  %v309_v2 = vld [vmem:[%s1349_s22 + $0xd0] sm:$0xff]  ;;  %v310_v3 = vld [vmem:[%s1349_s22 + $0xd8] sm:$0xff] }
  0x23   : > { %v327_v58 = vpack.c.bf16 %v308_v57, %v307_v56  ;;  %v328_v4 = vpack.c.bf16 %v310_v3, %v309_v2  ;;  %v311_v12 = vld [vmem:[%s1349_s22 + $0xe0] sm:$0xff]  ;;  %v312_v13 = vld [vmem:[%s1349_s22 + $0xe8] sm:$0xff]  ;;  %v313_v22 = vld [vmem:[%s1349_s22 + $0xf0] sm:$0xff] }
  0x24   : > { %608 = vmatpush.bf16.msra.mxu1 %v1092_v24  ;;  %1101 = vmatpush.bf16.msra.mxu2 %v1092_v24  ;;  %v314_v23 = vld [vmem:[%s1349_s22 + $0xf8] sm:$0xff] }
  0x25   : > { %v330_v24 = vpack.c.bf16 %v314_v23, %v313_v22 }
  0x28   : > { %609 = vmatpush.bf16.msra.mxu1 %v1091_v27  ;;  %1102 = vmatpush.bf16.msra.mxu2 %v1091_v27 }
  0x2c   : > { %610 = vmatpush.bf16.msra.mxu1 %v1090_v29  ;;  %1103 = vmatpush.bf16.msra.mxu2 %v1090_v29 }
  0x2e   : > { %1033 = vmatmul.msk.bf16.gmra.mxu0 %vm351_vm0, %v316_v8 }
  0x30   : > { %611 = vmatpush.bf16.msra.mxu1 %v1089_v33  ;;  %1104 = vmatpush.bf16.msra.mxu2 %v1089_v33 }
  0x31   : > { %1042 = vmatmul.msk.bf16.gmra.mxu3 %vm351_vm0, %v325_v40 }
  0x34   : > { %612 = vmatpush.bf16.msra.mxu1 %v1088_v34  ;;  %1105 = vmatpush.bf16.msra.mxu2 %v1088_v34 }
  0x3e   : > { %1034 = vmatmul.msk.bf16.gmra.mxu0 %vm351_vm0, %v317_v11 }
  0x41   : > { %1043 = vmatmul.msk.bf16.gmra.mxu3 %vm351_vm0, %v326_v48 }
  0x4e   : > { %1035 = vmatmul.msk.bf16.gmra.mxu0 %vm351_vm0, %v318_v14  ;;  %v329_v14 = vpack.c.bf16 %v312_v13, %v311_v12 }
  0x51   : > { %1044 = vmatmul.msk.bf16.gmra.mxu3 %vm351_vm0, %v327_v58 }
  0x5e   : > { %1036 = vmatmul.msk.bf16.gmra.mxu0 %vm351_vm0, %v319_v17 }
  0x61   : > { %1045 = vmatmul.msk.bf16.gmra.mxu3 %vm351_vm0, %v328_v4 }
  0x6e   : > { %1037 = vmatmul.msk.bf16.gmra.mxu0 %vm351_vm0, %v320_v21 }
  0x71   : > { %1046 = vmatmul.msk.bf16.gmra.mxu3 %vm351_vm0, %v329_v14 }
  0x7e   : > { %1038 = vmatmul.msk.bf16.gmra.mxu0 %vm351_vm0, %v321_v28 }
  0x81   : > { %1047 = vmatmul.msk.bf16.gmra.mxu3 %vm351_vm0, %v330_v24 }
  0x8e   : > { %1039 = vmatmul.msk.bf16.gmra.mxu0 %vm351_vm0, %v322_v37 }
  0x9b   : > { %v409_v44 = vpop.f32.mrf.mxu0 }
  0x9c   : > { %v410_v49 = vadd.f32 %v1412_v47, %v409_v44 }
  0x9e   : > { %1040 = vmatmul.msk.bf16.gmra.mxu0 %vm351_vm0, %v323_v43  ;;  %v489_v52 = vmax.f32 %v410_v49, 0.0 }
  0xa3   : > { %v411_v50 = vpop.f32.mrf.mxu0 }
  0xa4   : > { %v412_v51 = vadd.f32 %v1412_v47, %v411_v50  ;;  %v454_v46 = vpop.f32.mrf.mxu3 }
  0xa6   : > { %v490_v53 = vmax.f32 %v412_v51, 0.0 }
  0xa8   : > { %v521_v54 = vpack.c.bf16 %v490_v53, %v489_v52 }
  0xaa   : > { %613 = vmatmul.bf16.vlgmr.msra.gmra.mxu1 %v521_v54 }
  0xab   : > { %v414_v55 = vpop.f32.mrf.mxu0 }
  0xac   : > { %v415_v59 = vadd.f32 %v1412_v47, %v414_v55  ;;  %v456_v51 = vpop.f32.mrf.mxu3 }
  0xae   : > { %v491_v62 = vmax.f32 %v415_v59, 0.0 }
  0xb3   : > { %v416_v60 = vpop.f32.mrf.mxu0 }
  0xb4   : > { %v417_v61 = vadd.f32 %v1412_v47, %v416_v60  ;;  %v459_v56 = vpop.f32.mrf.mxu3 }
  0xb6   : > { %v492_v63 = vmax.f32 %v417_v61, 0.0 }
  0xb8   : > { %v522_v0 = vpack.c.bf16 %v492_v63, %v491_v62 }
  0xba   : > { %618 = vmatmul.bf16.gmra.mxu1 %v522_v0  ;;  %v455_v0 = vadd.f32 %v1412_v47, %v454_v46 }
  0xbb   : > { %v419_v1 = vpop.f32.mrf.mxu0 }
  0xbc   : > { %v420_v5 = vadd.f32 %v1412_v47, %v419_v1  ;;  %v461_v63 = vpop.f32.mrf.mxu3  ;;  %v457_v1 = vadd.f32 %v1412_v47, %v456_v51  ;;  %v507_v3 = vmax.f32 %v455_v0, 0.0  ;;  %v1463_v51 = vld [vmem:[%s1583_s4] ss:$0 sm:$0xff] }
  0xbe   : > { %v493_v8 = vmax.f32 %v420_v5, 0.0  ;;  %v508_v4 = vmax.f32 %v457_v1, 0.0 }
  0xc0   : > { %v530_v5 = vpack.c.bf16 %v508_v4, %v507_v3 }
  0xc3   : > { %v421_v6 = vpop.f32.mrf.mxu0 }
  0xc4   : > { %v422_v7 = vadd.f32 %v1412_v47, %v421_v6  ;;  %v464_v2 = vpop.f32.mrf.mxu3 }
  0xc5   : > { %v465_v13 = vadd.f32 %v1412_v47, %v464_v2 }
  0xc6   : > { %v494_v9 = vmax.f32 %v422_v7, 0.0  ;;  %v460_v7 = vadd.f32 %v1412_v47, %v459_v56 }
  0xc8   : > { %v523_v10 = vpack.c.bf16 %v494_v9, %v493_v8  ;;  %v462_v8 = vadd.f32 %v1412_v47, %v461_v63  ;;  %v509_v9 = vmax.f32 %v460_v7, 0.0 }
  0xca   : > { %623 = vmatmul.bf16.gmra.mxu1 %v523_v10  ;;  %v510_v10 = vmax.f32 %v462_v8, 0.0 }
  0xcb   : > { %v424_v11 = vpop.f32.mrf.mxu0 }
  0xcc   : > { %v425_v15 = vadd.f32 %v1412_v47, %v424_v11  ;;  %v466_v6 = vpop.f32.mrf.mxu3  ;;  %v531_v12 = vpack.c.bf16 %v510_v10, %v509_v9 }
  0xcd   : > { %v467_v14 = vadd.f32 %v1412_v47, %v466_v6 }
  0xce   : > { %v495_v18 = vmax.f32 %v425_v15, 0.0 }
  0xd3   : > { %v426_v16 = vpop.f32.mrf.mxu0 }
  0xd4   : > { %v427_v17 = vadd.f32 %v1412_v47, %v426_v16  ;;  %v469_v11 = vpop.f32.mrf.mxu3  ;;  %v511_v16 = vmax.f32 %v465_v13, 0.0 }
  0xd6   : > { %v496_v19 = vmax.f32 %v427_v17, 0.0  ;;  %v512_v17 = vmax.f32 %v467_v14, 0.0 }
  0xd8   : > { %v524_v20 = vpack.c.bf16 %v496_v19, %v495_v18  ;;  %v532_v18 = vpack.c.bf16 %v512_v17, %v511_v16 }
  0xda   : > { %628 = vmatmul.bf16.gmra.mxu1 %v524_v20  ;;  %v470_v20 = vadd.f32 %v1412_v47, %v469_v11 }
  0xdb   : > { %v429_v21 = vpop.f32.mrf.mxu0 }
  0xdc   : > { %v430_v25 = vadd.f32 %v1412_v47, %v429_v21  ;;  %v471_v15 = vpop.f32.mrf.mxu3  ;;  %v513_v22 = vmax.f32 %v470_v20, 0.0 }
  0xdd   : > { %v472_v21 = vadd.f32 %v1412_v47, %v471_v15 }
  0xde   : > { %v497_v28 = vmax.f32 %v430_v25, 0.0 }
  0xdf   : > { %v514_v23 = vmax.f32 %v472_v21, 0.0 }
  0xe1   : > { %v533_v25 = vpack.c.bf16 %v514_v23, %v513_v22 }
  0xe3   : > { %v431_v26 = vpop.f32.mrf.mxu0 }
  0xe4   : > { %v432_v27 = vadd.f32 %v1412_v47, %v431_v26  ;;  %v474_v19 = vpop.f32.mrf.mxu3 }
  0xe6   : > { %v498_v29 = vmax.f32 %v432_v27, 0.0  ;;  %v475_v27 = vadd.f32 %v1412_v47, %v474_v19 }
  0xe8   : > { %v525_v30 = vpack.c.bf16 %v498_v29, %v497_v28  ;;  %v515_v29 = vmax.f32 %v475_v27, 0.0 }
  0xea   : > { %633 = vmatmul.bf16.gmra.mxu1 %v525_v30 }
  0xeb   : > { %v434_v31 = vpop.f32.mrf.mxu0 }
  0xec   : > { %v435_v32 = vadd.f32 %v1412_v47, %v434_v31  ;;  %v476_v24 = vpop.f32.mrf.mxu3 }
  0xed   : > { %v477_v28 = vadd.f32 %v1412_v47, %v476_v24 }
  0xee   : > { %v499_v35 = vmax.f32 %v435_v32, 0.0 }
  0xef   : > { %v516_v30 = vmax.f32 %v477_v28, 0.0 }
  0xf1   : > { %v534_v31 = vpack.c.bf16 %v516_v30, %v515_v29 }
  0xf3   : > { %v436_v33 = vpop.f32.mrf.mxu0 }
  0xf4   : > { %v437_v34 = vadd.f32 %v1412_v47, %v436_v33  ;;  %v479_v26 = vpop.f32.mrf.mxu3 }
  0xf5   : > { %v480_v33 = vadd.f32 %v1412_v47, %v479_v26 }
  0xf6   : > { %v500_v36 = vmax.f32 %v437_v34, 0.0 }
  0xf8   : > { %v526_v37 = vpack.c.bf16 %v500_v36, %v499_v35  ;;  %v517_v36 = vmax.f32 %v480_v33, 0.0 }
  0xfa   : > { %638 = vmatmul.bf16.gmra.mxu1 %v526_v37 }
  0xfb   : > { %v439_v38 = vpop.f32.mrf.mxu0 }
  0xfc   : > { %v440_v39 = vadd.f32 %v1412_v47, %v439_v38  ;;  %v481_v32 = vpop.f32.mrf.mxu3 }
  0xfd   : > { %v482_v34 = vadd.f32 %v1412_v47, %v481_v32 }
  0xfe   : > { %v501_v42 = vmax.f32 %v440_v39, 0.0 }
  0xff   : > { %v518_v37 = vmax.f32 %v482_v34, 0.0 }
 0x101   : > { %v535_v39 = vpack.c.bf16 %v518_v37, %v517_v36 }
 0x103   : > { %v441_v40 = vpop.f32.mrf.mxu0 }
 0x104   : > { %v442_v41 = vadd.f32 %v1412_v47, %v441_v40  ;;  %v484_v35 = vpop.f32.mrf.mxu3 }
 0x106   : > { %v502_v43 = vmax.f32 %v442_v41, 0.0  ;;  %v485_v41 = vadd.f32 %v1412_v47, %v484_v35 }
 0x108   : > { %v527_v44 = vpack.c.bf16 %v502_v43, %v501_v42 }
 0x10a   : > { %643 = vmatmul.bf16.gmra.mxu1 %v527_v44  ;;  %v519_v44 = vmax.f32 %v485_v41, 0.0 }
 0x10b   : > { %v444_v45 = vpop.f32.mrf.mxu0 }
 0x10c   : > { %v445_v48 = vadd.f32 %v1412_v47, %v444_v45  ;;  %v486_v40 = vpop.f32.mrf.mxu3 }
 0x10d   : > { %v487_v42 = vadd.f32 %v1412_v47, %v486_v40 }
 0x10e   : > { %v503_v52 = vmax.f32 %v445_v48, 0.0 }
 0x10f   : > { %v520_v45 = vmax.f32 %v487_v42, 0.0 }
 0x111   : > { %v536_v46 = vpack.c.bf16 %v520_v45, %v519_v44 }
 0x113   : > { %v446_v49 = vpop.f32.mrf.mxu0 }
 0x114   : > { %v447_v50 = vadd.f32 %v1412_v47, %v446_v49 }
 0x116   : > { %v504_v53 = vmax.f32 %v447_v50, 0.0 }
 0x118   : > { %v528_v54 = vpack.c.bf16 %v504_v53, %v503_v52 }
 0x11a   : > { %648 = vmatmul.bf16.gmra.mxu1 %v528_v54 }
 0x11b   : > { %v449_v55 = vpop.f32.mrf.mxu0 }
 0x11c   : > { %v450_v57 = vadd.f32 %v1412_v47, %v449_v55 }
 0x11e   : > { %v505_v60 = vmax.f32 %v450_v57, 0.0 }
 0x123   : > { %v451_v58 = vpop.f32.mrf.mxu0 }
 0x124   : > { %v452_v59 = vadd.f32 %v1412_v47, %v451_v58  ;;  %v1471_v58 = vld [vmem:[%s1584_s5] ss:$0 sm:$0xff] }
 0x126   : > { %v506_v61 = vmax.f32 %v452_v59, 0.0 }
 0x127   : > { %v614_v38 = vpop.f32.mrf.mxu1 }
 0x128   : > { %v529_v62 = vpack.c.bf16 %v506_v61, %v505_v60  ;;  %v615_v54 = vadd.f32 %v1463_v51, %v614_v38 }
 0x12a   : > { %653 = vmatmul.bf16.vlgmr.msra.gmra.mxu2 %v529_v62  ;;  %v694_v57 = vmax.f32 %v615_v54, 0.0 }
 0x12c   : > { %v730_v0 = vmul.f32 %v1471_v58, %v694_v57 }
 0x12f   : > { %v616_v43 = vpop.f32.mrf.mxu1 }
 0x130   : > { %v617_v53 = vadd.f32 %v1463_v51, %v616_v43 }
 0x132   : > { %v695_v55 = vmax.f32 %v617_v53, 0.0 }
 0x134   : > { %v731_v61 = vmul.f32 %v1471_v58, %v695_v55 }
 0x136   : > { %v762_v3 = vpack.c.bf16 %v731_v61, %v730_v0 }
 0x137   : > { %v619_v48 = vpop.f32.mrf.mxu1 }
 0x138   : > { %v620_v7 = vadd.f32 %v1463_v51, %v619_v48 }
 0x13a   : > { %658 = vmatmul.bf16.gmra.mxu2 %v530_v5 }
 0x13f   : > { %v621_v49 = vpop.f32.mrf.mxu1 }
 0x140   : > { %v622_v6 = vadd.f32 %v1463_v51, %v621_v49 }
 0x142   : > { %v697_v10 = vmax.f32 %v622_v6, 0.0 }
 0x144   : > { %v733_v15 = vmul.f32 %v1471_v58, %v697_v10 }
 0x147   : > { %v624_v52 = vpop.f32.mrf.mxu1 }
 0x14a   : > { %663 = vmatmul.bf16.gmra.mxu2 %v531_v12  ;;  %v696_v12 = vmax.f32 %v620_v7, 0.0 }
 0x14c   : > { %v732_v17 = vmul.f32 %v1471_v58, %v696_v12 }
 0x14e   : > { %v763_v20 = vpack.c.bf16 %v733_v15, %v732_v17 }
 0x14f   : > { %v626_v63 = vpop.f32.mrf.mxu1 }
 0x150   : > { %v627_v24 = vadd.f32 %v1463_v51, %v626_v63 }
 0x152   : > { %v699_v27 = vmax.f32 %v627_v24, 0.0 }
 0x154   : > { %v735_v33 = vmul.f32 %v1471_v58, %v699_v27 }
 0x157   : > { %v629_v9 = vpop.f32.mrf.mxu1 }
 0x158   : > { %v630_v43 = vadd.f32 %v1463_v51, %v629_v9 }
 0x15a   : > { %668 = vmatmul.bf16.gmra.mxu2 %v532_v18  ;;  %v700_v48 = vmax.f32 %v630_v43, 0.0 }
 0x15c   : > { %v736_v54 = vmul.f32 %v1471_v58, %v700_v48 }
 0x15f   : > { %v631_v22 = vpop.f32.mrf.mxu1 }
 0x160   : > { %v632_v41 = vadd.f32 %v1463_v51, %v631_v22 }
 0x162   : > { %v701_v45 = vmax.f32 %v632_v41, 0.0 }
 0x167   : > { %v634_v32 = vpop.f32.mrf.mxu1 }
 0x16a   : > { %673 = vmatmul.bf16.gmra.mxu2 %v533_v25  ;;  %v625_v25 = vadd.f32 %v1463_v51, %v624_v52  ;;  %v737_v52 = vmul.f32 %v1471_v58, %v701_v45 }
 0x16c   : > { %v698_v29 = vmax.f32 %v625_v25, 0.0  ;;  %v765_v57 = vpack.c.bf16 %v737_v52, %v736_v54 }
 0x16e   : > { %v734_v35 = vmul.f32 %v1471_v58, %v698_v29 }
 0x16f   : > { %v636_v42 = vpop.f32.mrf.mxu1 }
 0x170   : > { %v764_v38 = vpack.c.bf16 %v735_v33, %v734_v35  ;;  %v637_v61 = vadd.f32 %v1463_v51, %v636_v42 }
 0x172   : > { %v703_v0 = vmax.f32 %v637_v61, 0.0 }
 0x174   : > { %v739_v6 = vmul.f32 %v1471_v58, %v703_v0 }
 0x17a   : > { %678 = vmatmul.bf16.gmra.mxu2 %v534_v31 }
 0x18a   : > { %683 = vmatmul.bf16.gmra.mxu2 %v535_v39 }
 0x19a   : > { %688 = vmatmul.bf16.gmra.mxu2 %v536_v46 }
 0x1ad   : > { %v654_v50 = vpop.f32.mrf.mxu2 }
 0x1ae   : > { %v655_v47 = vadd.f32 %v1463_v51, %v654_v50 }
 0x1b0   : > { %v710_v59 = vmax.f32 %v655_v47, 0.0 }
 0x1b2   : > { %v746_v1 = vmul.f32 %v1471_v58, %v710_v59 }
 0x1b5   : > { %v656_v56 = vpop.f32.mrf.mxu2 }
 0x1b6   : > { %v657_v60 = vadd.f32 %v1463_v51, %v656_v56  ;;  %v639_v56 = vpop.f32.mrf.mxu1 }
 0x1b8   : > { %v711_v62 = vmax.f32 %v657_v60, 0.0 }
 0x1ba   : > { %v747_v2 = vmul.f32 %v1471_v58, %v711_v62  ;;  %v635_v62 = vadd.f32 %v1463_v51, %v634_v32 }
 0x1bc   : > { %v770_v4 = vpack.c.bf16 %v747_v2, %v746_v1 }
 0x1bd   : > { %v659_v5 = vpop.f32.mrf.mxu2 }
 0x1be   : > { %1146 = vxpose.binary.xlu0.c.b16.start [1/16] %v770_v4, %v762_v3, 128  ;;  %v660_v8 = vadd.f32 %v1463_v51, %v659_v5  ;;  %v641_v1 = vpop.f32.mrf.mxu1  ;;  %v702_v3 = vmax.f32 %v635_v62, 0.0 }
 0x1bf   : > { %v642_v15 = vadd.f32 %v1463_v51, %v641_v1 }
 0x1c0   : > { %v712_v13 = vmax.f32 %v660_v8, 0.0  ;;  %v738_v8 = vmul.f32 %v1471_v58, %v702_v3  ;;  %v884_v3 = vld [vmem:[#allocation2] sm:$0x1] }
 0x1c2   : > { %v748_v18 = vmul.f32 %v1471_v58, %v712_v13 }
 0x1c5   : > { %v661_v11 = vpop.f32.mrf.mxu2 }
 0x1c6   : > { %v662_v14 = vadd.f32 %v1463_v51, %v661_v11  ;;  %v766_v11 = vpack.c.bf16 %v739_v6, %v738_v8 }
 0x1c8   : > { %v713_v16 = vmax.f32 %v662_v14, 0.0  ;;  %v644_v14 = vpop.f32.mrf.mxu1 }
 0x1c9   : > { %v645_v33 = vadd.f32 %v1463_v51, %v644_v14 }
 0x1ca   : > { %v749_v19 = vmul.f32 %v1471_v58, %v713_v16  ;;  %v640_v16 = vadd.f32 %v1463_v51, %v639_v56 }
 0x1cc   : > { %v771_v21 = vpack.c.bf16 %v749_v19, %v748_v18  ;;  %v705_v18 = vmax.f32 %v642_v15, 0.0 }
 0x1cd   : > { %v664_v23 = vpop.f32.mrf.mxu2 }
 0x1ce   : > { %1147 = vxpose.binary.xlu0.c.b16.cont [2/16] %v771_v21, %v763_v20, 128  ;;  %v665_v26 = vadd.f32 %v1463_v51, %v664_v23  ;;  %v704_v20 = vmax.f32 %v640_v16, 0.0  ;;  %v741_v23 = vmul.f32 %v1471_v58, %v705_v18 }
 0x1d0   : > { %v714_v30 = vmax.f32 %v665_v26, 0.0  ;;  %v646_v25 = vpop.f32.mrf.mxu1  ;;  %v740_v26 = vmul.f32 %v1471_v58, %v704_v20 }
 0x1d1   : > { %v647_v32 = vadd.f32 %v1463_v51, %v646_v25 }
 0x1d2   : > { %v750_v36 = vmul.f32 %v1471_v58, %v714_v30  ;;  %v767_v29 = vpack.c.bf16 %v741_v23, %v740_v26 }
 0x1d5   : > { %v666_v28 = vpop.f32.mrf.mxu2 }
 0x1d6   : > { %v667_v31 = vadd.f32 %v1463_v51, %v666_v28 }
 0x1d8   : > { %v715_v34 = vmax.f32 %v667_v31, 0.0  ;;  %v649_v35 = vpop.f32.mrf.mxu1 }
 0x1da   : > { %v751_v37 = vmul.f32 %v1471_v58, %v715_v34 }
 0x1dc   : > { %v772_v39 = vpack.c.bf16 %v751_v37, %v750_v36  ;;  %v707_v36 = vmax.f32 %v647_v32, 0.0 }
 0x1dd   : > { %v669_v40 = vpop.f32.mrf.mxu2 }
 0x1de   : > { %1148 = vxpose.binary.xlu0.c.b16.cont [3/16] %v772_v39, %v764_v38, 128  ;;  %v670_v44 = vadd.f32 %v1463_v51, %v669_v40  ;;  %v706_v38 = vmax.f32 %v645_v33, 0.0  ;;  %v743_v41 = vmul.f32 %v1471_v58, %v707_v36 }
 0x1e0   : > { %v716_v49 = vmax.f32 %v670_v44, 0.0  ;;  %v742_v43 = vmul.f32 %v1471_v58, %v706_v38 }
 0x1e2   : > { %v752_v47 = vmul.f32 %v1471_v58, %v716_v49  ;;  %v651_v49 = vpop.f32.mrf.mxu1 }
 0x1e3   : > { %v652_v52 = vadd.f32 %v1463_v51, %v651_v49 }
 0x1e5   : > { %v671_v46 = vpop.f32.mrf.mxu2 }
 0x1e6   : > { %v672_v50 = vadd.f32 %v1463_v51, %v671_v46  ;;  %v768_v46 = vpack.c.bf16 %v743_v41, %v742_v43 }
 0x1e8   : > { %v717_v53 = vmax.f32 %v672_v50, 0.0 }
 0x1ea   : > { %v753_v55 = vmul.f32 %v1471_v58, %v717_v53  ;;  %v650_v53 = vadd.f32 %v1463_v51, %v649_v35 }
 0x1ec   : > { %v773_v59 = vpack.c.bf16 %v753_v55, %v752_v47  ;;  %v709_v47 = vmax.f32 %v652_v52, 0.0  ;;  %v708_v56 = vmax.f32 %v650_v53, 0.0 }
 0x1ed   : > { %v674_v60 = vpop.f32.mrf.mxu2 }
 0x1ee   : > { %1149 = vxpose.binary.xlu0.c.b16.cont [4/16] %v773_v59, %v765_v57, 128  ;;  %v675_v63 = vadd.f32 %v1463_v51, %v674_v60  ;;  %v745_v60 = vmul.f32 %v1471_v58, %v709_v47  ;;  %v744_v62 = vmul.f32 %v1471_v58, %v708_v56 }
 0x1f0   : > { %v718_v4 = vmax.f32 %v675_v63, 0.0  ;;  %v769_v1 = vpack.c.bf16 %v745_v60, %v744_v62 }
 0x1f2   : > { %v754_v9 = vmul.f32 %v1471_v58, %v718_v4  ;;  %v1247_v4 = vmov 0  }
 0x1f3   : > { %1170 = vset.pattern.permute.xlu1 %v1247_v4 }
 0x1f4   : > { %887 = vperm.xlu1 %1170, %v884_v3  }
 0x1f5   : > { %v676_v2 = vpop.f32.mrf.mxu2 }
 0x1f6   : > { %v677_v5 = vadd.f32 %v1463_v51, %v676_v2 }
 0x1f8   : > { %v719_v7 = vmax.f32 %v677_v5, 0.0 }
 0x1fa   : > { %v755_v10 = vmul.f32 %v1471_v58, %v719_v7 }
 0x1fc   : > { %v774_v12 = vpack.c.bf16 %v755_v10, %v754_v9 }
 0x1fd   : > { %v679_v13 = vpop.f32.mrf.mxu2 }
 0x1fe   : > { %1150 = vxpose.binary.xlu0.c.b16.cont [5/16] %v774_v12, %v766_v11, 128  ;;  %v680_v17 = vadd.f32 %v1463_v51, %v679_v13 }
 0x200   : > { %v720_v21 = vmax.f32 %v680_v17, 0.0 }
 0x202   : > { %v756_v27 = vmul.f32 %v1471_v58, %v720_v21 }
 0x205   : > { %v681_v19 = vpop.f32.mrf.mxu2 }
 0x206   : > { %v682_v22 = vadd.f32 %v1463_v51, %v681_v19 }
 0x208   : > { %v721_v24 = vmax.f32 %v682_v22, 0.0 }
 0x20a   : > { %v757_v28 = vmul.f32 %v1471_v58, %v721_v24 }
 0x20c   : > { %v775_v30 = vpack.c.bf16 %v757_v28, %v756_v27 }
 0x20d   : > { %v684_v31 = vpop.f32.mrf.mxu2 }
 0x20e   : > { %1151 = vxpose.binary.xlu0.c.b16.cont [6/16] %v775_v30, %v767_v29, 128  ;;  %v685_v34 = vadd.f32 %v1463_v51, %v684_v31 }
 0x210   : > { %v722_v39 = vmax.f32 %v685_v34, 0.0 }
 0x212   : > { %v758_v44 = vmul.f32 %v1471_v58, %v722_v39 }
 0x215   : > { %v686_v37 = vpop.f32.mrf.mxu2 }
 0x216   : > { %v687_v40 = vadd.f32 %v1463_v51, %v686_v37 }
 0x218   : > { %v723_v42 = vmax.f32 %v687_v40, 0.0 }
 0x21a   : > { %v759_v45 = vmul.f32 %v1471_v58, %v723_v42 }
 0x21c   : > { %v776_v48 = vpack.c.bf16 %v759_v45, %v758_v44 }
 0x21d   : > { %v689_v50 = vpop.f32.mrf.mxu2 }
 0x21e   : > { %1152 = vxpose.binary.xlu0.c.b16.cont [7/16] %v776_v48, %v768_v46, 128  ;;  %v690_v54 = vadd.f32 %v1463_v51, %v689_v50 }
 0x220   : > { %v724_v57 = vmax.f32 %v690_v54, 0.0 }
 0x222   : > { %v760_v63 = vmul.f32 %v1471_v58, %v724_v57 }
 0x225   : > { %v691_v55 = vpop.f32.mrf.mxu2 }
 0x226   : > { %v692_v59 = vadd.f32 %v1463_v51, %v691_v55 }
 0x228   : > { %v725_v61 = vmax.f32 %v692_v59, 0.0 }
 0x22a   : > { %v761_v0 = vmul.f32 %v1471_v58, %v725_v61 }
 0x22c   : > { %v777_v2 = vpack.c.bf16 %v761_v0, %v760_v63 }
 0x22e   : > { %1153 = vxpose.binary.xlu0.c.b16.end [8/16] %v777_v2, %v769_v1, 128 }
 0x26a   : > { %v1154_v5 = vpop.trf.xlu0 }
 0x26b   : > { %v810_v7 = vunpack.c.l.bf16 %v1154_v5  ;;  %v812_v51 = vunpack.c.h.bf16 %v1154_v5 }
 0x26d   : > { %v842_v9 = vadd.f32 %v812_v51, %v810_v7 }
 0x272   : > { %v1155_v6 = vpop.trf.xlu0 }
 0x273   : > { %v811_v13 = vunpack.c.l.bf16 %v1155_v6  ;;  %v813_v14 = vunpack.c.h.bf16 %v1155_v6 }
 0x275   : > { %v863_v16 = vadd.f32 %v813_v14, %v811_v13 }
 0x27a   : > { %v1156_v8 = vpop.trf.xlu0 }
 0x27b   : > { %v814_v10 = vunpack.c.l.bf16 %v1156_v8  ;;  %v816_v11 = vunpack.c.h.bf16 %v1156_v8 }
 0x27d   : > { %v843_v12 = vadd.f32 %v842_v9, %v814_v10 }
 0x27f   : > { %v844_v15 = vadd.f32 %v843_v12, %v816_v11 }
 0x282   : > { %v1157_v58 = vpop.trf.xlu0 }
 0x283   : > { %v815_v17 = vunpack.c.l.bf16 %v1157_v58  ;;  %v817_v18 = vunpack.c.h.bf16 %v1157_v58 }
 0x285   : > { %v864_v19 = vadd.f32 %v863_v16, %v815_v17 }
 0x287   : > { %v865_v20 = vadd.f32 %v864_v19, %v817_v18  ;;  %v888_v19 = vpop.permute.xlu1 %887 }
 0x28a   : > { %v1158_v21 = vpop.trf.xlu0 }
 0x28b   : > { %v818_v22 = vunpack.c.l.bf16 %v1158_v21  ;;  %v820_v23 = vunpack.c.h.bf16 %v1158_v21 }
 0x28d   : > { %v845_v24 = vadd.f32 %v844_v15, %v818_v22 }
 0x28f   : > { %v846_v25 = vadd.f32 %v845_v24, %v820_v23  ;;  %v890_v24 = vperm.slane %v888_v19, 0 }
 0x292   : > { %v1159_v26 = vpop.trf.xlu0 }
 0x293   : > { %v819_v34 = vunpack.c.l.bf16 %v1159_v26  ;;  %v821_v39 = vunpack.c.h.bf16 %v1159_v26 }
 0x295   : > { %1171 = vset.pattern.permute.xlu0 %v1247_v4  ;;  %v866_v36 = vadd.f32 %v865_v20, %v819_v34 }
 0x297   : > { %v867_v43 = vadd.f32 %v866_v36, %v821_v39 }
 0x29a   : > { %v1160_v27 = vpop.trf.xlu0 }
 0x29b   : > { %v822_v32 = vunpack.c.l.bf16 %v1160_v27  ;;  %v824_v37 = vunpack.c.h.bf16 %v1160_v27 }
 0x29d   : > { %v847_v35 = vadd.f32 %v846_v25, %v822_v32 }
 0x29f   : > { %v848_v40 = vadd.f32 %v847_v35, %v824_v37 }
 0x2a2   : > { %v1161_v28 = vpop.trf.xlu0 }
 0x2a3   : > { %v823_v41 = vunpack.c.l.bf16 %v1161_v28  ;;  %v825_v49 = vunpack.c.h.bf16 %v1161_v28 }
 0x2a5   : > { %v868_v45 = vadd.f32 %v867_v43, %v823_v41 }
 0x2a7   : > { %v869_v53 = vadd.f32 %v868_v45, %v825_v49 }
 0x2aa   : > { %v1162_v29 = vpop.trf.xlu0 }
 0x2ab   : > { %v826_v38 = vunpack.c.l.bf16 %v1162_v29  ;;  %v828_v46 = vunpack.c.h.bf16 %v1162_v29 }
 0x2ad   : > { %v849_v44 = vadd.f32 %v848_v40, %v826_v38 }
 0x2af   : > { %v850_v50 = vadd.f32 %v849_v44, %v828_v46 }
 0x2b2   : > { %v1163_v30 = vpop.trf.xlu0 }
 0x2b3   : > { %v827_v52 = vunpack.c.l.bf16 %v1163_v30  ;;  %v829_v59 = vunpack.c.h.bf16 %v1163_v30 }
 0x2b5   : > { %v870_v55 = vadd.f32 %v869_v53, %v827_v52 }
 0x2b7   : > { %v871_v62 = vadd.f32 %v870_v55, %v829_v59  ;;  %v937_v55 = vlaneseq }
 0x2b9   : > { %vm939_vm10 = vcmp.lt.s32.totalorder %v937_v55, 256 }
 0x2ba   : > { %v1164_v31 = vpop.trf.xlu0 }
 0x2bb   : > { %v830_v48 = vunpack.c.l.bf16 %v1164_v31  ;;  %v832_v56 = vunpack.c.h.bf16 %v1164_v31 }
 0x2bd   : > { %v851_v54 = vadd.f32 %v850_v50, %v830_v48 }
 0x2bf   : > { %v852_v60 = vadd.f32 %v851_v54, %v832_v56 }
 0x2c2   : > { %v1165_v33 = vpop.trf.xlu0 }
 0x2c3   : > { %v831_v61 = vunpack.c.l.bf16 %v1165_v33  ;;  %v833_v3 = vunpack.c.h.bf16 %v1165_v33 }
 0x2c5   : > { %v872_v0 = vadd.f32 %v871_v62, %v831_v61 }
 0x2c7   : > { %v873_v7 = vadd.f32 %v872_v0, %v833_v3 }
 0x2ca   : > { %v1166_v42 = vpop.trf.xlu0 }
 0x2cb   : > { %v834_v57 = vunpack.c.l.bf16 %v1166_v42  ;;  %v836_v1 = vunpack.c.h.bf16 %v1166_v42 }
 0x2cd   : > { %v853_v63 = vadd.f32 %v852_v60, %v834_v57 }
 0x2cf   : > { %v854_v4 = vadd.f32 %v853_v63, %v836_v1 }
 0x2d2   : > { %v1167_v47 = vpop.trf.xlu0 }
 0x2d3   : > { %v835_v5 = vunpack.c.l.bf16 %v1167_v47  ;;  %v837_v11 = vunpack.c.h.bf16 %v1167_v47 }
 0x2d5   : > { %v874_v9 = vadd.f32 %v873_v7, %v835_v5 }
 0x2d7   : > { %v875_v14 = vadd.f32 %v874_v9, %v837_v11 }
 0x2da   : > { %v1168_v2 = vpop.trf.xlu0 }
 0x2db   : > { %v838_v6 = vunpack.c.l.bf16 %v1168_v2  ;;  %v840_v51 = vunpack.c.h.bf16 %v1168_v2 }
 0x2dd   : > { %v855_v8 = vadd.f32 %v854_v4, %v838_v6 }
 0x2df   : > { %v856_v10 = vadd.f32 %v855_v8, %v840_v51 }
 0x2e1   : > { %v857_v12 = vrot.slane %v856_v10, 4 }
 0x2e2   : > { %v1169_v13 = vpop.trf.xlu0 }
 0x2e3   : > { %v858_v15 = vadd.f32 %v857_v12, %v856_v10  ;;  %v839_v58 = vunpack.c.l.bf16 %v1169_v13  ;;  %v841_v16 = vunpack.c.h.bf16 %v1169_v13 }
 0x2e5   : > { %v876_v17 = vadd.f32 %v875_v14, %v839_v58  ;;  %v859_v18 = vrot.slane %v858_v15, 2 }
 0x2e7   : > { %v877_v20 = vadd.f32 %v876_v17, %v841_v16  ;;  %v860_v21 = vadd.f32 %v859_v18, %v858_v15 }
 0x2e9   : > { %v878_v22 = vrot.slane %v877_v20, 4  ;;  %v861_v23 = vrot.slane %v860_v21, 1 }
 0x2eb   : > { %v879_v25 = vadd.f32 %v878_v22, %v877_v20  ;;  %v862_v26 = vadd.f32 %v861_v23, %v860_v21 }
 0x2ed   : > { %v880_v27 = vrot.slane %v879_v25, 2  ;;  %v891_v28 = vadd.f32 %v890_v24, %v862_v26 }
 0x2ef   : > { %v881_v29 = vadd.f32 %v880_v27, %v879_v25  ;;  %v1080_v30 = vmul.f32 -1.442695, %v891_v28 }
 0x2f1   : > { %v882_v31 = vrot.slane %v881_v29, 1  ;;  %1175 = vpow2.f32 %v1080_v30 }
 0x2f3   : > { %v883_v32 = vadd.f32 %v882_v31, %v881_v29 }
 0x2f5   : > { %v892_v33 = vadd.f32 %v890_v24, %v883_v32 }
 0x2f7   : > { %v1176_v34 = vpop.eup %1175  ;;  %v1081_v35 = vmul.f32 -1.442695, %v892_v33 }
 0x2f8   : > { %v899_v36 = vadd.f32 1.0, %v1176_v34 }
 0x2f9   : > { %1177 = vpow2.f32 %v1081_v35 }
 0x2fa   : > { %1179 = vrcp.f32 %v899_v36  ;;  %vm906_vm3 = vweird.f32 %v899_v36  ;;  %v912_v52 = vand.u32 2147483648, %v899_v36  ;;  %v910_v54 = vand.u32 2147483647, %v899_v36 }
 0x2fc   : > { %v913_v60 = vor.u32 1.1754944e-38, %v912_v52  ;;  %vm911_vm9 = vcmp.eq.f32.partialorder %v910_v54, 8.507059e+37 }
 0x2ff   : > { %v1178_v37 = vpop.eup %1177 }
 0x300   : > { %v1180_v38 = vpop.eup %1179  ;;  %v900_v39 = vadd.f32 1.0, %v1178_v37 }
 0x301   : > { %v902_v40 = vmul.f32 %v1180_v38, %v899_v36  ;;  %vm907_vm1 = vweird.f32 %v1180_v38 }
 0x302   : > { %1181 = vrcp.f32 %v900_v39  ;;  %v927_v46 = vand.u32 2147483648, %v900_v39  ;;  %v925_v50 = vand.u32 2147483647, %v900_v39  ;;  %vm1543_vm4 = vmor %vm906_vm3, %vm907_vm1  ;;  %vm921_vm5 = vweird.f32 %v900_v39 }
 0x303   : > { %v903_v41 = vsub.f32 1.0, %v902_v40 }
 0x304   : > { %v928_v56 = vor.u32 1.1754944e-38, %v927_v46  ;;  %vm926_vm7 = vcmp.eq.f32.partialorder %v925_v50, 8.507059e+37 }
 0x305   : > { %v904_v44 = vmul.f32 %v1180_v38, %v903_v41 }
 0x307   : > { %v905_v48 = vadd.f32 %v1180_v38, %v904_v44 }
 0x308   : > { %v1182_v42 = vpop.eup %1181 }
 0x309   : > { %v917_v43 = vmul.f32 %v1182_v42, %v900_v39  ;;  %vm922_vm2 = vweird.f32 %v1182_v42  ;;  %v909_v57 = vsel %vm1543_vm4, %v1180_v38, %v905_v48 }
 0x30a   : > { %vm923_vm6 = vmor %vm921_vm5, %vm922_vm2  ;;  %v914_v63 = vsel %vm911_vm9, %v913_v60, %v909_v57 }
 0x30b   : > { %v918_v45 = vsub.f32 1.0, %v917_v43 }
 0x30d   : > { %v919_v49 = vmul.f32 %v1182_v42, %v918_v45 }
 0x30f   : > { %v920_v47 = vadd.f32 %v1182_v42, %v919_v49 }
 0x311   : > { %v924_v59 = vsel %vm923_vm6, %v1182_v42, %v920_v47 }
 0x312   : > { %v929_v61 = vsel %vm926_vm7, %v928_v56, %v924_v59 }
 0x313   : > { %v933_v62 = vrot.slane %v929_v61, 7 }
 0x315   : > { %v935_v0 = vsel %vm934_vm8, %v914_v63, %v933_v62 }
 0x316   : > { %941 = vst.msk [vmem:[%s274_s6] sm:$0x3] %vm939_vm10, %v935_v0 }
 0x317   : > { %1210 = shalt.err (!%p1207_p3)
}
 0x318   : > { %1106 = dma.vmem_to_hbm [thread:$0]  (%p1329_p5), %s956_s21, 32, %s958_s23, %s943_s24  }
 0x319 PF: > { %p1112_p4 = scmp.ge.s32.totalorder %s1245_s29, 2  ;;  %s969_s15 = sand.u32 1, %s1233_s26  }
 0x31a   : > { %s970_s17 = scalar_lea.sflag [#allocation4], %s969_s15 }
 0x31b   : > { %p1109_p7 = pnand %p1112_p4, %p1333_p6 }
 0x31d   : > { %p1110_p8 = pneg %p1109_p7 }
 0x31f   : > { %1228 = dma.done.wait (%p1110_p8), %s970_s17, 32  }
 0x320   : > { %1230 = vsyncadd (%p1110_p8), %s970_s17, 4294967264  ;;  %p19_p9 = scmp.ge.s32.totalorder %s1316_s8, 10   ;;  %s1591_s26 = smov %s1237_s27 }
 0x321   : > { %s1592_s27 = smov %s1241_s28  ;;  %s1593_s28 = smov %s1327_s11 }
 0x322   : > { %s1594_s29 = smov %s1316_s8  ;;  %21 = sbr.rel (!%p19_p9) target bundleno = 6 (0x6), region = 83 }
 0x327   :  { %976 = vsyncpa [#allocation4], 1 }
 0x328   :  { %978 = vsyncpa [#allocation4 + $0x1], 1 }

</bundles_post_ra>
